<compile_context>
chip_gen: v6e
topology: v6e:2x2x1
jax: 0.10.0
libtpu: 0.0.40
codegen_flags: <defaults>
</compile_context>

<pallas_src>
import functools

import jax
import jax.numpy as jnp
from jax.experimental import pallas as pl
from jax.experimental.pallas import tpu as pltpu


def _round_up(x, m):
    return ((x + m - 1) // m) * m


def _vae_kernel(max_action,
                s_ref, a_ref, ns_ref, eps_ref,
                we1_ref, be1_ref, we2_ref, be2_ref,
                wh_ref, bh_ref,
                wd1_ref, bd1_ref, wd2_ref, bd2_ref, wd3_ref, bd3_ref,
                out_ref):
    bf16 = jnp.bfloat16
    f32 = jnp.float32

    # In-kernel bf16 cast + lane-concat (inputs are read from HBM exactly once).
    s = s_ref[...].astype(bf16)
    a = a_ref[...].astype(bf16)
    ns = ns_ref[...].astype(bf16)

    # Encoder: h = relu(e1([s, a, ns])); h = relu(e2(h))  -- single dot per layer.
    x = jnp.concatenate([s, a, ns], axis=-1)
    h = jnp.dot(x, we1_ref[...], preferred_element_type=f32) + be1_ref[...]
    h = jnp.maximum(h, 0.0).astype(bf16)
    h = jnp.dot(h, we2_ref[...], preferred_element_type=f32) + be2_ref[...]
    h = jnp.maximum(h, 0.0).astype(bf16)

    # Fused mean | log_std head: one matmul, then lane-slice.
    heads = jnp.dot(h, wh_ref[...], preferred_element_type=f32) + bh_ref[...]
    latent = heads.shape[-1] // 2
    mean = heads[:, :latent]
    log_std = jnp.clip(heads[:, latent:], -4.0, 15.0)
    std = jnp.exp(log_std)
    z = mean + std * eps_ref[...].astype(f32)     # reparameterization

    # Decoder: d1 fused into ONE matmul on the lane-concatenated [s, ns, z].
    dec_in = jnp.concatenate([s, ns, z.astype(bf16)], axis=-1)
    d = jnp.dot(dec_in, wd1_ref[...], preferred_element_type=f32) + bd1_ref[...]
    d = jnp.maximum(d, 0.0).astype(bf16)
    d = jnp.dot(d, wd2_ref[...], preferred_element_type=f32) + bd2_ref[...]
    d = jnp.maximum(d, 0.0).astype(bf16)
    u = max_action * jnp.tanh(
        jnp.dot(d, wd3_ref[...], preferred_element_type=f32) + bd3_ref[...])

    # Pack [u | mean | std | zero-pad] into one lane-dense bf16 slab
    # -> single unmasked store, half the writeback bytes of f32.
    packed = jnp.concatenate([u, mean, std], axis=-1).astype(out_ref.dtype)
    pad = out_ref.shape[-1] - packed.shape[-1]
    if pad > 0:
        packed = jnp.concatenate(
            [packed, jnp.zeros((packed.shape[0], pad), out_ref.dtype)], axis=-1)
    out_ref[...] = packed


def pack_vae_params(params):
    """One-time weight repack (do this OUTSIDE the per-call path).

    - e1 / d1 weights stay whole (inputs are lane-concatenated in-kernel).
    - mean/log_std heads fused into one (H, 2L) matrix.
    - all matmul operands cast to bf16 once; biases stay f32 (added to f32 acc).
    """
    (we1, be1, we2, be2, wm, bm, wls, bls,
     wd1, bd1, wd2, bd2, wd3, bd3) = params
    assert wm.shape == wls.shape, "mean/log_std heads must have identical widths"
    bf16 = jnp.bfloat16
    f32 = jnp.float32
    return (
        we1.astype(bf16), be1.astype(f32),
        we2.astype(bf16), be2.astype(f32),
        jnp.concatenate([wm, wls], axis=1).astype(bf16),      # (H, 2L)
        jnp.concatenate([bm, bls], axis=1).astype(f32),
        wd1.astype(bf16), bd1.astype(f32),
        wd2.astype(bf16), bd2.astype(f32),
        wd3.astype(bf16), bd3.astype(f32),
    )


def vae_forward_pallas(packed_params, state, action, next_state, noise, max_action,
                       block_rows=2048):
    """Fused VAE forward: returns (u, mean, std) exactly like VAE.forward."""
    B, S = state.shape
    A = action.shape[1]
    L = noise.shape[1]

    # Noise travels as bf16 (half the bytes); upcast to f32 inside the kernel.
    noise = noise.astype(jnp.bfloat16)

    # Lane-dense packed output width (u | mean | std, padded to a multiple of 128).
    P = _round_up(A + 2 * L, 128)

    # Batch tiling: as big as possible (per-step overhead + MXU fill/drain
    # amortization); force >=2 grid steps when the batch is large enough so the
    # "parallel" grid axis can shard across v7x's two TensorCores.
    bb = B if B <= block_rows else block_rows
    if B >= 16 and pl.cdiv(B, bb) < 2:
        bb = _round_up(pl.cdiv(B, 2), 8)
    grid = (pl.cdiv(B, bb),)

    row = lambda i: (i, 0)       # batch-blocked arrays
    const = lambda i: (0, 0)     # weights stay resident in VMEM across the grid

    w_list = list(packed_params)
    in_specs = ([pl.BlockSpec((bb, S), row),       # state   (f32, read once)
                 pl.BlockSpec((bb, A), row),       # action
                 pl.BlockSpec((bb, S), row),       # next_state
                 pl.BlockSpec((bb, L), row)]       # noise   (bf16)
                + [pl.BlockSpec(w.shape, const) for w in w_list])

    # Advisory cost estimate: six matmuls + exp/tanh per row, memory-bound.
    H = w_list[2].shape[0]                         # we2 is (H, H)
    flops_per_row = 2 * ((2 * S + A) * H + H * H + H * 2 * L
                         + (2 * S + L) * H + H * H + H * A)
    weight_bytes = sum(int(w.size) * w.dtype.itemsize for w in w_list)
    bytes_accessed = int(B * ((2 * S + A) * 4 + 2 * L + 2 * P) + weight_bytes)
    cost = pl.CostEstimate(flops=int(B * flops_per_row),
                           transcendentals=int(B * (L + A)),
                           bytes_accessed=bytes_accessed)

    out = pl.pallas_call(
        functools.partial(_vae_kernel, float(max_action)),
        out_shape=jax.ShapeDtypeStruct((B, P), jnp.bfloat16),
        grid=grid,
        in_specs=in_specs,
        out_specs=pl.BlockSpec((bb, P), row),
        compiler_params=pltpu.CompilerParams(
            dimension_semantics=("parallel",)),
        cost_estimate=cost,
    )(state, action, next_state, noise, *w_list)

    out = out.astype(jnp.float32)
    u = out[:, :A]
    mean = out[:, A:A + L]
    std = out[:, A + L:A + 2 * L]
    return u, mean, std


def vae_forward_ref(params, state, action, next_state, noise, max_action):
    """Pure-JAX f32 reference mirroring the PyTorch forward, for validation."""
    (we1, be1, we2, be2, wm, bm, wls, bls,
     wd1, bd1, wd2, bd2, wd3, bd3) = params
    x = jnp.concatenate([state, action, next_state], axis=1)
    h = jax.nn.relu(x @ we1 + be1)
    h = jax.nn.relu(h @ we2 + be2)
    mean = h @ wm + bm
    log_std = jnp.clip(h @ wls + bls, -4.0, 15.0)
    std = jnp.exp(log_std)
    z = mean + std * noise
    obs = jnp.concatenate([state, next_state, z], axis=1)
    d = jax.nn.relu(obs @ wd1 + bd1)
    d = jax.nn.relu(d @ wd2 + bd2)
    u = max_action * jnp.tanh(d @ wd3 + bd3)
    return u, mean, std


def _init_linear(key, fan_in, fan_out):
    # Deterministic init matching torch.nn.Linear's U(-1/sqrt(fan_in), 1/sqrt(fan_in)).
    kw, kb = jax.random.split(key)
    bound = float(fan_in) ** -0.5
    w = jax.random.uniform(kw, (fan_in, fan_out), jnp.float32, -bound, bound)
    b = jax.random.uniform(kb, (1, fan_out), jnp.float32, -bound, bound)
    return w, b


def init_vae_params(key, state_dim, action_dim, latent_dim, hidden_dim):
    keys = jax.random.split(key, 7)
    we1, be1 = _init_linear(keys[0], 2 * state_dim + action_dim, hidden_dim)
    we2, be2 = _init_linear(keys[1], hidden_dim, hidden_dim)
    wm, bm = _init_linear(keys[2], hidden_dim, latent_dim)
    wls, bls = _init_linear(keys[3], hidden_dim, latent_dim)
    wd1, bd1 = _init_linear(keys[4], 2 * state_dim + latent_dim, hidden_dim)
    wd2, bd2 = _init_linear(keys[5], hidden_dim, hidden_dim)
    wd3, bd3 = _init_linear(keys[6], hidden_dim, action_dim)
    return (we1, be1, we2, be2, wm, bm, wls, bls,
            wd1, bd1, wd2, bd2, wd3, bd3)


if __name__ == "__main__":
    # Small, forward-consistent shapes.
    B, state_dim, action_dim, latent_dim, hidden_dim = 8, 12, 4, 8, 128
    max_action = 2.0

    root = jax.random.PRNGKey(0)
    k_params, k_s, k_a, k_ns, k_eps = jax.random.split(root, 5)

    params = init_vae_params(k_params, state_dim, action_dim, latent_dim, hidden_dim)
    packed_params = jax.tree_util.tree_map(
        jax.block_until_ready, pack_vae_params(params))   # one-time repack

    state = jax.random.normal(k_s, (B, state_dim), jnp.float32)
    action = jax.random.normal(k_a, (B, action_dim), jnp.float32)
    next_state = jax.random.normal(k_ns, (B, state_dim), jnp.float32)
    noise = jax.random.normal(k_eps, (B, latent_dim), jnp.float32)  # torch.randn_like(std)

    u, mean, std = jax.block_until_ready(
        vae_forward_pallas(packed_params, state, action, next_state, noise, max_action))

    u_r, mean_r, std_r = vae_forward_ref(params, state, action, next_state, noise, max_action)
    assert u.shape == (B, action_dim)
    assert mean.shape == (B, latent_dim)
    assert std.shape == (B, latent_dim)
    # bf16 operands/outputs with f32 accumulation -> relaxed tolerance vs f32 reference.
    assert jnp.allclose(u, u_r, atol=3e-2, rtol=3e-2)
    assert jnp.allclose(mean, mean_r, atol=3e-2, rtol=3e-2)
    assert jnp.allclose(std, std_r, atol=3e-2, rtol=3e-2)

    print("KERNEL_OK")
</pallas_src>

<mosaic_0001>
module attributes {stable_mosaic.version = 11 : i64} {
  func.func @_vae_kernel(%arg0: i32, %arg1: memref<8x12xf32, #tpu.memory_space<vmem>>, %arg2: memref<8x4xf32, #tpu.memory_space<vmem>>, %arg3: memref<8x12xf32, #tpu.memory_space<vmem>>, %arg4: memref<8x8xbf16, #tpu.memory_space<vmem>>, %arg5: memref<28x128xbf16, #tpu.memory_space<vmem>>, %arg6: memref<1x128xf32, #tpu.memory_space<vmem>>, %arg7: memref<128x128xbf16, #tpu.memory_space<vmem>>, %arg8: memref<1x128xf32, #tpu.memory_space<vmem>>, %arg9: memref<128x16xbf16, #tpu.memory_space<vmem>>, %arg10: memref<1x16xf32, #tpu.memory_space<vmem>>, %arg11: memref<32x128xbf16, #tpu.memory_space<vmem>>, %arg12: memref<1x128xf32, #tpu.memory_space<vmem>>, %arg13: memref<128x128xbf16, #tpu.memory_space<vmem>>, %arg14: memref<1x128xf32, #tpu.memory_space<vmem>>, %arg15: memref<128x4xbf16, #tpu.memory_space<vmem>>, %arg16: memref<1x4xf32, #tpu.memory_space<vmem>>, %arg17: memref<8x128xbf16, #tpu.memory_space<vmem>>) attributes {dimension_semantics = [#tpu.dimension_semantics<parallel>], iteration_bounds = array<i64: 1>, scalar_prefetch = 0 : i64, scratch_operands = 0 : i64, tpu.core_type = #tpu.core_type<tc>, window_params = [{transform_indices = @transform_0, window_bounds = array<i64: 8, 12>}, {transform_indices = @transform_1, window_bounds = array<i64: 8, 4>}, {transform_indices = @transform_2, window_bounds = array<i64: 8, 12>}, {transform_indices = @transform_3, window_bounds = array<i64: 8, 8>}, {pipeline_mode = #tpu.pipeline_mode<synchronous>, transform_indices = @transform_4, window_bounds = array<i64: 28, 128>}, {pipeline_mode = #tpu.pipeline_mode<synchronous>, transform_indices = @transform_5, window_bounds = array<i64: 1, 128>}, {pipeline_mode = #tpu.pipeline_mode<synchronous>, transform_indices = @transform_6, window_bounds = array<i64: 128, 128>}, {pipeline_mode = #tpu.pipeline_mode<synchronous>, transform_indices = @transform_7, window_bounds = array<i64: 1, 128>}, {pipeline_mode = #tpu.pipeline_mode<synchronous>, transform_indices = @transform_8, window_bounds = array<i64: 128, 16>}, {pipeline_mode = #tpu.pipeline_mode<synchronous>, transform_indices = @transform_9, window_bounds = array<i64: 1, 16>}, {pipeline_mode = #tpu.pipeline_mode<synchronous>, transform_indices = @transform_10, window_bounds = array<i64: 32, 128>}, {pipeline_mode = #tpu.pipeline_mode<synchronous>, transform_indices = @transform_11, window_bounds = array<i64: 1, 128>}, {pipeline_mode = #tpu.pipeline_mode<synchronous>, transform_indices = @transform_12, window_bounds = array<i64: 128, 128>}, {pipeline_mode = #tpu.pipeline_mode<synchronous>, transform_indices = @transform_13, window_bounds = array<i64: 1, 128>}, {pipeline_mode = #tpu.pipeline_mode<synchronous>, transform_indices = @transform_14, window_bounds = array<i64: 128, 4>}, {pipeline_mode = #tpu.pipeline_mode<synchronous>, transform_indices = @transform_15, window_bounds = array<i64: 1, 4>}, {transform_indices = @transform_16, window_bounds = array<i64: 8, 128>}]} {
    %c0 = arith.constant 0 : index
    %c0_0 = arith.constant 0 : index
    %0 = vector.load %arg1[%c0, %c0_0] : memref<8x12xf32, #tpu.memory_space<vmem>>, vector<8x12xf32>
    %1 = arith.truncf %0 : vector<8x12xf32> to vector<8x12xbf16>
    %c0_1 = arith.constant 0 : index
    %c0_2 = arith.constant 0 : index
    %2 = vector.load %arg2[%c0_1, %c0_2] : memref<8x4xf32, #tpu.memory_space<vmem>>, vector<8x4xf32>
    %3 = arith.truncf %2 : vector<8x4xf32> to vector<8x4xbf16>
    %c0_3 = arith.constant 0 : index
    %c0_4 = arith.constant 0 : index
    %4 = vector.load %arg3[%c0_3, %c0_4] : memref<8x12xf32, #tpu.memory_space<vmem>>, vector<8x12xf32>
    %5 = arith.truncf %4 : vector<8x12xf32> to vector<8x12xbf16>
    %6 = tpu.concatenate %1, %3, %5 in 1 : vector<8x12xbf16>, vector<8x4xbf16>, vector<8x12xbf16> -> vector<8x28xbf16>
    %c0_5 = arith.constant 0 : index
    %c0_6 = arith.constant 0 : index
    %7 = vector.load %arg5[%c0_5, %c0_6] : memref<28x128xbf16, #tpu.memory_space<vmem>>, vector<28x128xbf16>
    %cst = arith.constant dense<0.000000e+00> : vector<8x128xf32>
    %8 = tpu.matmul %6, %7, %cst {dimension_numbers = #tpu.dot_dimension_numbers<[1], [0], [0], [1], [0, 0, 1, 1], [], []>} : vector<8x28xbf16>, vector<28x128xbf16>, vector<8x128xf32> -> vector<8x128xf32>
    %c0_7 = arith.constant 0 : index
    %c0_8 = arith.constant 0 : index
    %9 = vector.load %arg6[%c0_7, %c0_8] : memref<1x128xf32, #tpu.memory_space<vmem>>, vector<1x128xf32>
    %10 = vector.broadcast %9 : vector<1x128xf32> to vector<8x128xf32>
    %11 = arith.addf %8, %10 : vector<8x128xf32>
    %cst_9 = arith.constant 0.000000e+00 : f32
    %12 = vector.broadcast %cst_9 : f32 to vector<8x128xf32>
    %13 = arith.maximumf %11, %12 : vector<8x128xf32>
    %14 = arith.truncf %13 : vector<8x128xf32> to vector<8x128xbf16>
    %c0_10 = arith.constant 0 : index
    %c0_11 = arith.constant 0 : index
    %15 = vector.load %arg7[%c0_10, %c0_11] : memref<128x128xbf16, #tpu.memory_space<vmem>>, vector<128x128xbf16>
    %cst_12 = arith.constant dense<0.000000e+00> : vector<8x128xf32>
    %16 = tpu.matmul %14, %15, %cst_12 {dimension_numbers = #tpu.dot_dimension_numbers<[1], [0], [0], [1], [0, 0, 1, 1], [], []>} : vector<8x128xbf16>, vector<128x128xbf16>, vector<8x128xf32> -> vector<8x128xf32>
    %c0_13 = arith.constant 0 : index
    %c0_14 = arith.constant 0 : index
    %17 = vector.load %arg8[%c0_13, %c0_14] : memref<1x128xf32, #tpu.memory_space<vmem>>, vector<1x128xf32>
    %18 = vector.broadcast %17 : vector<1x128xf32> to vector<8x128xf32>
    %19 = arith.addf %16, %18 : vector<8x128xf32>
    %cst_15 = arith.constant 0.000000e+00 : f32
    %20 = vector.broadcast %cst_15 : f32 to vector<8x128xf32>
    %21 = arith.maximumf %19, %20 : vector<8x128xf32>
    %22 = arith.truncf %21 : vector<8x128xf32> to vector<8x128xbf16>
    %c0_16 = arith.constant 0 : index
    %c0_17 = arith.constant 0 : index
    %23 = vector.load %arg9[%c0_16, %c0_17] : memref<128x16xbf16, #tpu.memory_space<vmem>>, vector<128x16xbf16>
    %cst_18 = arith.constant dense<0.000000e+00> : vector<8x16xf32>
    %24 = tpu.matmul %22, %23, %cst_18 {dimension_numbers = #tpu.dot_dimension_numbers<[1], [0], [0], [1], [0, 0, 1, 1], [], []>} : vector<8x128xbf16>, vector<128x16xbf16>, vector<8x16xf32> -> vector<8x16xf32>
    %c0_19 = arith.constant 0 : index
    %c0_20 = arith.constant 0 : index
    %25 = vector.load %arg10[%c0_19, %c0_20] : memref<1x16xf32, #tpu.memory_space<vmem>>, vector<1x16xf32>
    %26 = vector.broadcast %25 : vector<1x16xf32> to vector<8x16xf32>
    %27 = arith.addf %24, %26 : vector<8x16xf32>
    %28 = vector.extract_strided_slice %27 {offsets = [0, 0], sizes = [8, 8], strides = [1, 1]} : vector<8x16xf32> to vector<8x8xf32>
    %29 = vector.extract_strided_slice %27 {offsets = [0, 8], sizes = [8, 8], strides = [1, 1]} : vector<8x16xf32> to vector<8x8xf32>
    %cst_21 = arith.constant -4.000000e+00 : f32
    %cst_22 = arith.constant 1.500000e+01 : f32
    %30 = vector.broadcast %cst_21 : f32 to vector<8x8xf32>
    %31 = arith.maximumf %30, %29 : vector<8x8xf32>
    %32 = vector.broadcast %cst_22 : f32 to vector<8x8xf32>
    %33 = arith.minimumf %32, %31 : vector<8x8xf32>
    %34 = math.exp %33 : vector<8x8xf32>
    %c0_23 = arith.constant 0 : index
    %c0_24 = arith.constant 0 : index
    %35 = vector.load %arg4[%c0_23, %c0_24] : memref<8x8xbf16, #tpu.memory_space<vmem>>, vector<8x8xbf16>
    %36 = arith.extf %35 : vector<8x8xbf16> to vector<8x8xf32>
    %37 = arith.mulf %34, %36 : vector<8x8xf32>
    %38 = arith.addf %28, %37 : vector<8x8xf32>
    %39 = arith.truncf %38 : vector<8x8xf32> to vector<8x8xbf16>
    %40 = tpu.concatenate %1, %5, %39 in 1 : vector<8x12xbf16>, vector<8x12xbf16>, vector<8x8xbf16> -> vector<8x32xbf16>
    %c0_25 = arith.constant 0 : index
    %c0_26 = arith.constant 0 : index
    %41 = vector.load %arg11[%c0_25, %c0_26] : memref<32x128xbf16, #tpu.memory_space<vmem>>, vector<32x128xbf16>
    %cst_27 = arith.constant dense<0.000000e+00> : vector<8x128xf32>
    %42 = tpu.matmul %40, %41, %cst_27 {dimension_numbers = #tpu.dot_dimension_numbers<[1], [0], [0], [1], [0, 0, 1, 1], [], []>} : vector<8x32xbf16>, vector<32x128xbf16>, vector<8x128xf32> -> vector<8x128xf32>
    %c0_28 = arith.constant 0 : index
    %c0_29 = arith.constant 0 : index
    %43 = vector.load %arg12[%c0_28, %c0_29] : memref<1x128xf32, #tpu.memory_space<vmem>>, vector<1x128xf32>
    %44 = vector.broadcast %43 : vector<1x128xf32> to vector<8x128xf32>
    %45 = arith.addf %42, %44 : vector<8x128xf32>
    %cst_30 = arith.constant 0.000000e+00 : f32
    %46 = vector.broadcast %cst_30 : f32 to vector<8x128xf32>
    %47 = arith.maximumf %45, %46 : vector<8x128xf32>
    %48 = arith.truncf %47 : vector<8x128xf32> to vector<8x128xbf16>
    %c0_31 = arith.constant 0 : index
    %c0_32 = arith.constant 0 : index
    %49 = vector.load %arg13[%c0_31, %c0_32] : memref<128x128xbf16, #tpu.memory_space<vmem>>, vector<128x128xbf16>
    %cst_33 = arith.constant dense<0.000000e+00> : vector<8x128xf32>
    %50 = tpu.matmul %48, %49, %cst_33 {dimension_numbers = #tpu.dot_dimension_numbers<[1], [0], [0], [1], [0, 0, 1, 1], [], []>} : vector<8x128xbf16>, vector<128x128xbf16>, vector<8x128xf32> -> vector<8x128xf32>
    %c0_34 = arith.constant 0 : index
    %c0_35 = arith.constant 0 : index
    %51 = vector.load %arg14[%c0_34, %c0_35] : memref<1x128xf32, #tpu.memory_space<vmem>>, vector<1x128xf32>
    %52 = vector.broadcast %51 : vector<1x128xf32> to vector<8x128xf32>
    %53 = arith.addf %50, %52 : vector<8x128xf32>
    %cst_36 = arith.constant 0.000000e+00 : f32
    %54 = vector.broadcast %cst_36 : f32 to vector<8x128xf32>
    %55 = arith.maximumf %53, %54 : vector<8x128xf32>
    %56 = arith.truncf %55 : vector<8x128xf32> to vector<8x128xbf16>
    %c0_37 = arith.constant 0 : index
    %c0_38 = arith.constant 0 : index
    %57 = vector.load %arg15[%c0_37, %c0_38] : memref<128x4xbf16, #tpu.memory_space<vmem>>, vector<128x4xbf16>
    %cst_39 = arith.constant dense<0.000000e+00> : vector<8x4xf32>
    %58 = tpu.matmul %56, %57, %cst_39 {dimension_numbers = #tpu.dot_dimension_numbers<[1], [0], [0], [1], [0, 0, 1, 1], [], []>} : vector<8x128xbf16>, vector<128x4xbf16>, vector<8x4xf32> -> vector<8x4xf32>
    %c0_40 = arith.constant 0 : index
    %c0_41 = arith.constant 0 : index
    %59 = vector.load %arg16[%c0_40, %c0_41] : memref<1x4xf32, #tpu.memory_space<vmem>>, vector<1x4xf32>
    %60 = vector.broadcast %59 : vector<1x4xf32> to vector<8x4xf32>
    %61 = arith.addf %58, %60 : vector<8x4xf32>
    %62 = math.tanh %61 : vector<8x4xf32>
    %cst_42 = arith.constant 2.000000e+00 : f32
    %63 = vector.broadcast %cst_42 : f32 to vector<8x4xf32>
    %64 = arith.mulf %63, %62 : vector<8x4xf32>
    %65 = tpu.concatenate %64, %28, %34 in 1 : vector<8x4xf32>, vector<8x8xf32>, vector<8x8xf32> -> vector<8x20xf32>
    %66 = arith.truncf %65 : vector<8x20xf32> to vector<8x20xbf16>
    %cst_43 = arith.constant 0.000000e+00 : bf16
    %67 = vector.broadcast %cst_43 : bf16 to vector<8x108xbf16>
    %68 = tpu.concatenate %66, %67 in 1 : vector<8x20xbf16>, vector<8x108xbf16> -> vector<8x128xbf16>
    %c0_44 = arith.constant 0 : index
    %c0_45 = arith.constant 0 : index
    %69 = vector.load %arg17[%c0_44, %c0_45] : memref<8x128xbf16, #tpu.memory_space<vmem>>, vector<8x128xbf16>
    tpu.vector_store %arg17[%c0_44, %c0_45], %68 {strides = array<i32>} : memref<8x128xbf16, #tpu.memory_space<vmem>>, vector<8x128xbf16>,
    return
  }
  func.func @transform_0(%arg0: i32) -> (i32, i32) {
    %c0_i32 = arith.constant 0 : i32
    %c0_i32_0 = arith.constant 0 : i32
    return %arg0, %c0_i32 : i32, i32
  }
  func.func @transform_1(%arg0: i32) -> (i32, i32) {
    %c0_i32 = arith.constant 0 : i32
    %c0_i32_0 = arith.constant 0 : i32
    return %arg0, %c0_i32 : i32, i32
  }
  func.func @transform_2(%arg0: i32) -> (i32, i32) {
    %c0_i32 = arith.constant 0 : i32
    %c0_i32_0 = arith.constant 0 : i32
    return %arg0, %c0_i32 : i32, i32
  }
  func.func @transform_3(%arg0: i32) -> (i32, i32) {
    %c0_i32 = arith.constant 0 : i32
    %c0_i32_0 = arith.constant 0 : i32
    return %arg0, %c0_i32 : i32, i32
  }
  func.func @transform_4(%arg0: i32) -> (i32, i32) {
    %c0_i32 = arith.constant 0 : i32
    %c0_i32_0 = arith.constant 0 : i32
    %c0_i32_1 = arith.constant 0 : i32
    return %c0_i32, %c0_i32_0 : i32, i32
  }
  func.func @transform_5(%arg0: i32) -> (i32, i32) {
    %c0_i32 = arith.constant 0 : i32
    %c0_i32_0 = arith.constant 0 : i32
    %c0_i32_1 = arith.constant 0 : i32
    return %c0_i32, %c0_i32_0 : i32, i32
  }
  func.func @transform_6(%arg0: i32) -> (i32, i32) {
    %c0_i32 = arith.constant 0 : i32
    %c0_i32_0 = arith.constant 0 : i32
    %c0_i32_1 = arith.constant 0 : i32
    return %c0_i32, %c0_i32_0 : i32, i32
  }
  func.func @transform_7(%arg0: i32) -> (i32, i32) {
    %c0_i32 = arith.constant 0 : i32
    %c0_i32_0 = arith.constant 0 : i32
    %c0_i32_1 = arith.constant 0 : i32
    return %c0_i32, %c0_i32_0 : i32, i32
  }
  func.func @transform_8(%arg0: i32) -> (i32, i32) {
    %c0_i32 = arith.constant 0 : i32
    %c0_i32_0 = arith.constant 0 : i32
    %c0_i32_1 = arith.constant 0 : i32
    return %c0_i32, %c0_i32_0 : i32, i32
  }
  func.func @transform_9(%arg0: i32) -> (i32, i32) {
    %c0_i32 = arith.constant 0 : i32
    %c0_i32_0 = arith.constant 0 : i32
    %c0_i32_1 = arith.constant 0 : i32
    return %c0_i32, %c0_i32_0 : i32, i32
  }
  func.func @transform_10(%arg0: i32) -> (i32, i32) {
    %c0_i32 = arith.constant 0 : i32
    %c0_i32_0 = arith.constant 0 : i32
    %c0_i32_1 = arith.constant 0 : i32
    return %c0_i32, %c0_i32_0 : i32, i32
  }
  func.func @transform_11(%arg0: i32) -> (i32, i32) {
    %c0_i32 = arith.constant 0 : i32
    %c0_i32_0 = arith.constant 0 : i32
    %c0_i32_1 = arith.constant 0 : i32
    return %c0_i32, %c0_i32_0 : i32, i32
  }
  func.func @transform_12(%arg0: i32) -> (i32, i32) {
    %c0_i32 = arith.constant 0 : i32
    %c0_i32_0 = arith.constant 0 : i32
    %c0_i32_1 = arith.constant 0 : i32
    return %c0_i32, %c0_i32_0 : i32, i32
  }
  func.func @transform_13(%arg0: i32) -> (i32, i32) {
    %c0_i32 = arith.constant 0 : i32
    %c0_i32_0 = arith.constant 0 : i32
    %c0_i32_1 = arith.constant 0 : i32
    return %c0_i32, %c0_i32_0 : i32, i32
  }
  func.func @transform_14(%arg0: i32) -> (i32, i32) {
    %c0_i32 = arith.constant 0 : i32
    %c0_i32_0 = arith.constant 0 : i32
    %c0_i32_1 = arith.constant 0 : i32
    return %c0_i32, %c0_i32_0 : i32, i32
  }
  func.func @transform_15(%arg0: i32) -> (i32, i32) {
    %c0_i32 = arith.constant 0 : i32
    %c0_i32_0 = arith.constant 0 : i32
    %c0_i32_1 = arith.constant 0 : i32
    return %c0_i32, %c0_i32_0 : i32, i32
  }
  func.func @transform_16(%arg0: i32) -> (i32, i32) {
    %c0_i32 = arith.constant 0 : i32
    %c0_i32_0 = arith.constant 0 : i32
    return %arg0, %c0_i32 : i32, i32
  }
}

</mosaic_0001>

<bundles_post_ra>
// kernel: tpu_custom_call.1
= control target key start
LH: loop header
LB: loop body
LE: loop exit
PB: predicated region body
PF: predicated region fallthrough
CT: control target
= control target key end

     0   :  { %s1447_s0 = inlined_call_operand.hbm [shape: f32[8,12], index: 0, kind: input, shape index: {}]   ;;  %s1448_s1 = inlined_call_operand.vmem [shape: f32[8,4], index: 1, kind: input, shape index: {}]   ;;  %s1449_s2 = inlined_call_operand.hbm [shape: f32[8,12], index: 2, kind: input, shape index: {}]   ;;  %s1450_s3 = inlined_call_operand.hbm [shape: bf16[8,8], index: 3, kind: input, shape index: {}]   ;;  %s1451_s4 = inlined_call_operand.vmem [shape: bf16[28,128], index: 4, kind: input, shape index: {}]   ;;  %s1452_s5 = inlined_call_operand.hbm [shape: f32[1,128], index: 5, kind: input, shape index: {}]   ;;  %s1453_s6 = inlined_call_operand.vmem [shape: bf16[128,128], index: 6, kind: input, shape index: {}]   ;;  %s1454_s7 = inlined_call_operand.hbm [shape: f32[1,128], index: 7, kind: input, shape index: {}]   ;;  %s1455_s8 = inlined_call_operand.vmem [shape: bf16[128,16], index: 8, kind: input, shape index: {}]   ;;  %s1456_s9 = inlined_call_operand.vmem [shape: f32[1,16], index: 9, kind: input, shape index: {}]   ;;  %s1457_s10 = inlined_call_operand.vmem [shape: bf16[32,128], index: 10, kind: input, shape index: {}]   ;;  %s1458_s11 = inlined_call_operand.vmem [shape: f32[1,128], index: 11, kind: input, shape index: {}]   ;;  %s1459_s12 = inlined_call_operand.vmem [shape: bf16[128,128], index: 12, kind: input, shape index: {}]   ;;  %s1460_s13 = inlined_call_operand.vmem [shape: f32[1,128], index: 13, kind: input, shape index: {}]   ;;  %s1461_s14 = inlined_call_operand.vmem [shape: bf16[128,4], index: 14, kind: input, shape index: {}]   ;;  %s1462_s15 = inlined_call_operand.vmem [shape: f32[1,4], index: 15, kind: input, shape index: {}]   ;;  %s1463_s16 = inlined_call_operand.hbm [shape: bf16[8,128], index: 16, kind: output, shape index: {}]  }
   0x1   :  { %1464 = sst [smem:[#allocation16_spill]] %s1447_s0 }
   0x2   :  { %21 = vsyncpa [#allocation3], 0 }
   0x3   :  { %22 = vsyncpa [#allocation6], 0 }
   0x4   :  { %23 = vsyncpa [#allocation9], 0 }
   0x5   :  { %24 = vsyncpa [#allocation4], 0  ;;  %s1152_s21 = smov [#allocation5]   ;;  %s1153_s23 = smov [#allocation8]  }
   0x6   :  { %s43_s22 = sshll.u32 %s1152_s21, 4  ;;  %s65_s24 = sshll.u32 %s1153_s23, 4  ;;  %s44_s22 = int_to_ptr.vmem [resolvable:$true] %s43_s22  ;;  %s66_s24 = int_to_ptr.vmem [resolvable:$true] %s65_s24 }
   0x7   :  { %s1032_s25 = scalar_lea.vmem %s44_s22, 128  ;;  %p1037_p1 = scmp.lt.s32.totalorder %s44_s22, %s44_s22 }
   0x8   :  { %p1033_p0 = scmp.ne.s32.totalorder %s44_s22, %s1032_s25  ;;  %p1038_p2 = scmp.lt.s32.totalorder %s1032_s25, %s1032_s25 }
   0xa   :  { %p1039_p3 = por %p1038_p2, %p1037_p1 }
   0xc   :  { %p1040_p4 = pnand %p1039_p3, %p1033_p0 }
   0xe   :  { %1043 = shalt.err (!%p1040_p4)
}
   0xf   :  { %46 = dma.hbm_to_vmem [thread:$0]  %s1449_s2, 128, %s44_s22, [#allocation6]  }
  0x10   :  { %s1052_s28 = scalar_lea.vmem %s66_s24, 16  ;;  %s1056_s29 = scalar_lea.vmem %s66_s24, 32 }
  0x11   :  { %p1053_p5 = scmp.ne.s32.totalorder %s66_s24, %s1052_s28  ;;  %p1057_p6 = scmp.lt.s32.totalorder %s66_s24, %s66_s24 }
  0x12   :  { %p1058_p7 = scmp.lt.s32.totalorder %s1056_s29, %s1052_s28 }
  0x14   :  { %p1059_p8 = por %p1058_p7, %p1057_p6 }
  0x16   :  { %p1060_p9 = pnand %p1059_p8, %p1053_p5 }
  0x18   :  { %1063 = shalt.err (!%p1060_p9)
}
  0x19   :  { %68 = dma.hbm_to_vmem [thread:$0]  %s1452_s5, 16, %s66_s24, [#allocation9]  }
  0x1a   :  { %s1154_s17 = smov [#allocation2]   ;;  %s1155_s19 = smov [#allocation7]  }
  0x1b   :  { %s31_s18 = sshll.u32 %s1154_s17, 4  ;;  %s53_s20 = sshll.u32 %s1155_s19, 4  ;;  %s32_s18 = int_to_ptr.vmem [resolvable:$true] %s31_s18  ;;  %s54_s20 = int_to_ptr.vmem [resolvable:$true] %s53_s20 }
  0x1c   :  { %s1072_s21 = scalar_lea.vmem %s32_s18, 128  ;;  %p1077_p11 = scmp.lt.s32.totalorder %s32_s18, %s32_s18 }
  0x1d   :  { %p1073_p10 = scmp.ne.s32.totalorder %s32_s18, %s1072_s21  ;;  %p1078_p12 = scmp.lt.s32.totalorder %s1072_s21, %s1072_s21 }
  0x1f   :  { %p1079_p13 = por %p1078_p12, %p1077_p11 }
  0x21   :  { %p1080_p0 = pnand %p1079_p13, %p1073_p10 }
  0x23   :  { %1083 = shalt.err (!%p1080_p0)
}
  0x24   :  { %s1465_s23 = sld [smem:[#allocation16_spill]]  ;;  %s1092_s25 = scalar_lea.vmem %s54_s20, 64 }
  0x25   :  { %p1093_p1 = scmp.ne.s32.totalorder %s54_s20, %s1092_s25  ;;  %p1097_p2 = scmp.lt.s32.totalorder %s54_s20, %s54_s20 }
  0x26   :  { %p1098_p3 = scmp.lt.s32.totalorder %s1092_s25, %s1092_s25 }
  0x28   :  { %p1099_p4 = por %p1098_p3, %p1097_p2 }
  0x2a   :  { %34 = dma.hbm_to_vmem [thread:$0]  %s1465_s23, 128, %s32_s18, [#allocation3]  }
  0x2b   :  { %p1100_p5 = pnand %p1099_p4, %p1093_p1 }
  0x2d   :  { %1103 = shalt.err (!%p1100_p5)
}
  0x2e   :  { %56 = dma.hbm_to_vmem [thread:$0]  %s1450_s3, 64, %s54_s20, [#allocation6]  }
  0x2f   :  { %s1156_s26 = smov [#allocation10]  }
  0x30   :  { %s77_s27 = sshll.u32 %s1156_s26, 4  ;;  %s78_s27 = int_to_ptr.vmem [resolvable:$true] %s77_s27 }
  0x31   :  { %s1112_s28 = scalar_lea.vmem %s78_s27, 16  ;;  %s1116_s29 = scalar_lea.vmem %s78_s27, 32 }
  0x32   :  { %p1113_p6 = scmp.ne.s32.totalorder %s78_s27, %s1112_s28  ;;  %p1117_p7 = scmp.lt.s32.totalorder %s78_s27, %s78_s27 }
  0x33   :  { %p1118_p8 = scmp.lt.s32.totalorder %s1116_s29, %s1112_s28 }
  0x35   :  { %p1119_p9 = por %p1118_p8, %p1117_p7 }
  0x37   :  { %p1120_p10 = pnand %p1119_p9, %p1113_p6 }
  0x39   :  { %1123 = shalt.err (!%p1120_p10)
}
  0x3a   :  { %80 = dma.hbm_to_vmem [thread:$0]  %s1454_s7, 16, %s78_s27, [#allocation9]  }
  0x3b   :  { %1144 = dma.done.wait [#allocation3], 128  }
  0x3c   :  { %1145 = vsyncadd [#allocation3], 4294967168 }
  0x3d   :  { %1146 = dma.done.wait [#allocation6], 192  }
  0x3e   :  { %1147 = vsyncadd [#allocation6], 4294967104 }
  0x3f   :  { %1148 = dma.done.wait [#allocation9], 32  }
  0x40   :  { %1149 = vsyncadd [#allocation9], 4294967264  ;;  %v1157_v0 = vmov 0.0   ;;  %vm1158_vm0 = vmmov 0   ;;  %v115_v1 = vld [vmem:[%s1448_s1] sm:$0xff]  ;;  %v117_v2 = vld [vmem:[#allocation5] sm:$0xff] }
  0x41   :  { %869 = vmatprep.subr.bf16.mxu0 %v1157_v0  ;;  %877 = vmatprep.subr.bf16.mxu1 %v1157_v0  ;;  %vm157_vm1 = vcmask 1045504   ;;  %v116_v3 = vpack.c.bf16 %v115_v1, %v115_v1  ;;  %v984_v4 = vld [vmem:[%s1451_s4 + $0x8] sm:$0x3f]   ;;  %s1159_s19 = smov 12   ;;  %v118_v5 = vpack.c.bf16 %v117_v2, %v117_v2  ;;  %v986_v7 = vld [vmem:[%s1453_s6 + $0x38] sm:$0xff]   ;;  %v985_v8 = vld [vmem:[%s1451_s4] sm:$0xff]  }
  0x42   :  { %873 = vmatprep.mubr.msk.bf16.mxu0 %vm1158_vm0, %v1157_v0  ;;  %893 = vmatprep.mubr.msk.bf16.mxu1 %vm1158_vm0, %v1157_v0  ;;  %v159_v6 = vsel %vm157_vm1, %v984_v4, 0  ;;  %v987_v9 = vld [vmem:[%s1453_s6 + $0x30] sm:$0xff]   ;;  %s1160_s25 = smov 16   ;;  %v988_v10 = vld [vmem:[%s1453_s6 + $0x28] sm:$0xff]   ;;  %v989_v11 = vld [vmem:[%s1453_s6 + $0x20] sm:$0xff]   ;;  %vm125_vm2 = vcmask 97280  }
  0x43   :  { %120 = vrot.lane.b32.xlu0 %v116_v3, %s1159_s19  ;;  %870 = vmatpush3.bf16.msra.mxu0 %v159_v6  ;;  %v990_v12 = vld [vmem:[%s1453_s6 + $0x18] sm:$0xff]   ;;  %v991_v13 = vld [vmem:[%s1453_s6 + $0x10] sm:$0xff]   ;;  %v113_v14 = vld [vmem:[#allocation2] sm:$0xff]  ;;  %vm129_vm3 = vcmask 130048   ;;  %vm154_vm4 = vcmask 228352   ;;  %s1161_s29 = smov 8  }
  0x44   :  { %871 = vmatprep.subr.bf16.mxu0 %v1157_v0  ;;  %878 = vmatpush3.bf16.msra.mxu1 %v986_v7  ;;  %v1307_v16 = vpack.c.bf16 %v113_v14, %v113_v14  ;;  %v992_v20 = vld [vmem:[%s1453_s6 + $0x8] sm:$0xff]   ;;  %v993_v21 = vld [vmem:[%s1453_s6] sm:$0xff]   ;;  %v994_v22 = vld [vmem:[%s1455_s8 + $0x38] sm:$0xff]   ;;  %s1163_s18 = smov 120   ;;  %s1164_s23 = smov 24   ;;  %vm451_vm5 = vcmask 195584  }
  0x45   :  { %879 = vmatprep.subr.bf16.mxu1 %v1157_v0  ;;  %v995_v23 = vld [vmem:[%s1455_s8 + $0x30] sm:$0xff]   ;;  %v996_v24 = vld [vmem:[%s1455_s8 + $0x28] sm:$0xff]   ;;  %v997_v25 = vld [vmem:[%s1455_s8 + $0x20] sm:$0xff]   ;;  %vm477_vm6 = vcmask 261120   ;;  %vm756_vm7 = vcmask 31744   ;;  %vm760_vm8 = vcmask 162816  }
  0x46   :  { %v998_v26 = vld [vmem:[%s1455_s8 + $0x18] sm:$0xff]   ;;  %v999_v27 = vld [vmem:[%s1455_s8 + $0x10] sm:$0xff]   ;;  %v1000_v36 = vld [vmem:[%s1455_s8 + $0x8] sm:$0xff]  }
  0x47   :  { %123 = vrot.lane.b32.xlu0 %v118_v5, %s1160_s25  ;;  %872 = vmatpush3.bf16.msra.mxu0 %v985_v8  ;;  %v783_v28 = vld [vmem:[#allocation8] ss:$0 sm:$0xff]  ;;  %v1001_v37 = vld [vmem:[%s1455_s8] sm:$0xff]   ;;  %v431_v38 = vld [vmem:[#allocation7] sm:$0xf] }
  0x48   :  { %880 = vmatpush3.bf16.msra.mxu1 %v987_v9  ;;  %897 = vmatprep.subr.bf16.mxu0 %v1157_v0  ;;  %v432_v39 = vunpack.c.l.bf16 %v431_v38  ;;  %v787_v40 = vld [vmem:[#allocation10] ss:$0 sm:$0xff]  ;;  %v796_v48 = vld [vmem:[%s1456_s9] ss:$0 sm:$0xff]  ;;  %v1002_v57 = vld [vmem:[%s1457_s10 + $0x8] sm:$0xff]   ;;  %s1162_s9 = smov 4  }
  0x49   :  { %881 = vmatprep.subr.bf16.mxu1 %v1157_v0  ;;  %v1003_v58 = vld [vmem:[%s1457_s10] sm:$0xff]   ;;  %v1004_v63 = vld [vmem:[%s1459_s12 + $0x38] sm:$0xff]   ;;  %v1005_v1 = vld [vmem:[%s1459_s12 + $0x30] sm:$0xff]  }
  0x4a   :  { %434 = vrot.lane.b32.xlu1 %v432_v39, %s1161_s29  ;;  %v1006_v2 = vld [vmem:[%s1459_s12 + $0x28] sm:$0xff]   ;;  %v1007_v6 = vld [vmem:[%s1459_s12 + $0x20] sm:$0xff]   ;;  %v1008_v7 = vld [vmem:[%s1459_s12 + $0x18] sm:$0xff]  }
  0x4b   :  { %444 = vrot.lane.b32.xlu0 %v118_v5, %s1159_s19  ;;  %v1009_v8 = vld [vmem:[%s1459_s12 + $0x10] sm:$0xff]   ;;  %v1011_v14 = vld [vmem:[%s1459_s12] sm:$0xff]  }
  0x4c   :  { %882 = vmatpush3.bf16.msra.mxu1 %v988_v10 }
  0x4d   :  { %883 = vmatprep.subr.bf16.mxu1 %v1157_v0 }
  0x50   :  { %884 = vmatpush3.bf16.msra.mxu1 %v989_v11 }
  0x51   :  { %885 = vmatprep.subr.bf16.mxu1 %v1157_v0 }
  0x54   :  { %886 = vmatpush3.bf16.msra.mxu1 %v990_v12 }
  0x55   :  { %887 = vmatprep.subr.bf16.mxu1 %v1157_v0 }
  0x58   :  { %888 = vmatpush3.bf16.msra.mxu1 %v991_v13  ;;  %v1010_v13 = vld [vmem:[%s1459_s12 + $0x8] sm:$0xff]  }
  0x59   :  { %889 = vmatprep.subr.bf16.mxu1 %v1157_v0 }
  0x5c   :  { %890 = vmatpush3.bf16.msra.mxu1 %v992_v20  ;;  %v1017_v20 = vld [vmem:[%s1461_s14 + $0x10] sm:$0xff]  }
  0x5d   :  { %891 = vmatprep.subr.bf16.mxu1 %v1157_v0 }
  0x60   :  { %892 = vmatpush3.bf16.msra.mxu1 %v993_v21  ;;  %v805_v21 = vld [vmem:[%s1458_s11] ss:$0 sm:$0xff] }
  0x61   :  { %917 = vmatprep.subr.bf16.mxu1 %v1157_v0 }
  0xb5   :  { %v121_v15 = vpop.permute.xlu0 %120 }
  0xb6   :  { %v128_v17 = vsel %vm125_vm2, %v1307_v16, %v121_v15  ;;  %v1012_v15 = vld [vmem:[%s1461_s14 + $0x38] sm:$0xff]  }
  0xb9   :  { %v124_v18 = vpop.permute.xlu0 %123 }
  0xba   :  { %v131_v19 = vsel %vm129_vm3, %v128_v17, %v124_v18  ;;  %v1014_v17 = vld [vmem:[%s1461_s14 + $0x28] sm:$0xff]   ;;  %v1015_v18 = vld [vmem:[%s1461_s14 + $0x20] sm:$0xff]  }
  0xbb   :  { %874 = vmatmul.mubr.msk.bf16.vlgmr.msra.gmra.mxu0 %vm154_vm4, %v131_v19  ;;  %v1016_v19 = vld [vmem:[%s1461_s14 + $0x18] sm:$0xff]  }
  0xbc   :  { %913 = vmatprep.mubr.msk.bf16.mxu0 %vm1158_vm0, %v1157_v0  ;;  %898 = vmatpush3.bf16.msra.mxu0 %v994_v22  ;;  %v435_v59 = vpop.permute.xlu1 %434 }
  0xbd   :  { %899 = vmatprep.subr.bf16.mxu0 %v1157_v0  ;;  %v445_v9 = vpop.permute.xlu0 %444 }
  0xbe   :  { %v450_v10 = vsel %vm125_vm2, %v1307_v16, %v445_v9  ;;  %v1013_v16 = vld [vmem:[%s1461_s14 + $0x30] sm:$0xff]  }
  0xc0   :  { %900 = vmatpush3.bf16.msra.mxu0 %v995_v23 }
  0xc1   :  { %901 = vmatprep.subr.bf16.mxu0 %v1157_v0 }
  0xc4   :  { %902 = vmatpush3.bf16.msra.mxu0 %v996_v24 }
  0xc5   :  { %903 = vmatprep.subr.bf16.mxu0 %v1157_v0 }
  0xc8   :  { %904 = vmatpush3.bf16.msra.mxu0 %v997_v25 }
  0xc9   :  { %905 = vmatprep.subr.bf16.mxu0 %v1157_v0 }
  0xcc   :  { %906 = vmatpush3.bf16.msra.mxu0 %v998_v26 }
  0xcd   :  { %907 = vmatprep.subr.bf16.mxu0 %v1157_v0 }
  0xd0   :  { %908 = vmatpush3.bf16.msra.mxu0 %v999_v27 }
  0xd1   :  { %909 = vmatprep.subr.bf16.mxu0 %v1157_v0 }
  0xd4   :  { %910 = vmatpush3.bf16.msra.mxu0 %v1000_v36 }
  0xd5   :  { %911 = vmatprep.subr.bf16.mxu0 %v1157_v0 }
  0xd8   :  { %912 = vmatpush3.bf16.msra.mxu0 %v1001_v37 }
  0xd9   :  { %925 = vmatprep.subr.bf16.mxu0 %v1157_v0 }
 0x17b   :  { %v195_v29 = vpop.f32.mrf.mxu0 }
 0x17c   :  { %v196_v30 = vadd.f32 %v783_v28, %v195_v29  ;;  %v1018_v29 = vld [vmem:[%s1461_s14 + $0x8] sm:$0xff]  }
 0x17d   :  { %v875_v31 = vpop.f32.mrf.mxu0 }
 0x17e   :  { %v201_v32 = vmax.f32 %v196_v30, 0.0  ;;  %v1019_v30 = vld [vmem:[%s1461_s14] sm:$0xff]  }
 0x17f   :  { %v198_v33 = vpop.f32.mrf.mxu0  ;;  %v809_v31 = vld [vmem:[%s1460_s13] ss:$0 sm:$0xff]  ;;  %s1165_s13 = smov [#allocation11]  }
 0x180   :  { %v202_v34 = vpack.c.bf16 %v201_v32, %v201_v32  ;;  %s772_s14 = sshll.u32 %s1165_s13, 4  ;;  %s773_s14 = int_to_ptr.vmem [resolvable:$true] %s772_s14 }
 0x181   :  { %v876_v35 = vpop.f32.mrf.mxu0  ;;  %p1129_p12 = scmp.lt.s32.totalorder %s773_s14, %s773_s14 }
 0x182   :  { %894 = vmatmul.mubr.bf16.vlgmr.msra.gmra.mxu1 %v202_v34 }
 0x183   :  { %921 = vmatprep.mubr.msk.bf16.mxu1 %vm1158_vm0, %v1157_v0  ;;  %918 = vmatpush3.bf16.msra.mxu1 %v1002_v57 }
 0x184   :  { %919 = vmatprep.subr.bf16.mxu1 %v1157_v0 }
 0x187   :  { %920 = vmatpush3.bf16.msra.mxu1 %v1003_v58 }
 0x188   :  { %945 = vmatprep.subr.bf16.mxu1 %v1157_v0 }
 0x242   :  { %v308_v41 = vpop.f32.mrf.mxu1 }
 0x243   :  { %v309_v42 = vadd.f32 %v787_v40, %v308_v41 }
 0x244   :  { %v895_v43 = vpop.f32.mrf.mxu1 }
 0x245   :  { %v314_v44 = vmax.f32 %v309_v42, 0.0 }
 0x246   :  { %v311_v45 = vpop.f32.mrf.mxu1 }
 0x247   :  { %v315_v46 = vpack.c.bf16 %v314_v44, %v314_v44 }
 0x248   :  { %v896_v47 = vpop.f32.mrf.mxu1 }
 0x249   :  { %914 = vmatmul.mubr.bf16.vlgmr.msra.gmra.mxu0 %v315_v46 }
 0x24a   :  { %941 = vmatprep.mubr.msk.bf16.mxu0 %vm1158_vm0, %v1157_v0  ;;  %926 = vmatpush3.bf16.msra.mxu0 %v1004_v63 }
 0x24b   :  { %927 = vmatprep.subr.bf16.mxu0 %v1157_v0 }
 0x24e   :  { %928 = vmatpush3.bf16.msra.mxu0 %v1005_v1 }
 0x24f   :  { %929 = vmatprep.subr.bf16.mxu0 %v1157_v0 }
 0x252   :  { %930 = vmatpush3.bf16.msra.mxu0 %v1006_v2 }
 0x253   :  { %931 = vmatprep.subr.bf16.mxu0 %v1157_v0 }
 0x256   :  { %932 = vmatpush3.bf16.msra.mxu0 %v1007_v6 }
 0x257   :  { %933 = vmatprep.subr.bf16.mxu0 %v1157_v0 }
 0x25a   :  { %934 = vmatpush3.bf16.msra.mxu0 %v1008_v7 }
 0x25b   :  { %935 = vmatprep.subr.bf16.mxu0 %v1157_v0 }
 0x25e   :  { %936 = vmatpush3.bf16.msra.mxu0 %v1009_v8 }
 0x25f   :  { %937 = vmatprep.subr.bf16.mxu0 %v1157_v0 }
 0x262   :  { %938 = vmatpush3.bf16.msra.mxu0 %v1010_v13 }
 0x263   :  { %939 = vmatprep.subr.bf16.mxu0 %v1157_v0 }
 0x266   :  { %940 = vmatpush3.bf16.msra.mxu0 %v1011_v14 }
 0x309   :  { %v421_v49 = vpop.f32.mrf.mxu0 }
 0x30a   :  { %v422_v50 = vadd.f32 %v796_v48, %v421_v49 }
 0x30b   :  { %v915_v51 = vpop.f32.mrf.mxu0 }
 0x30c   :  { %v427_v52 = vmax.f32 %v422_v50, -4.0 }
 0x30d   :  { %v424_v53 = vpop.f32.mrf.mxu0 }
 0x30e   :  { %v428_v54 = vmin.f32 %v427_v52, 15.0 }
 0x30f   :  { %v916_v55 = vpop.f32.mrf.mxu0 }
 0x310   :  { %v429_v56 = vmul.f32 1.442695, %v428_v54 }
 0x312   :  { %1020 = vpow2.f32 %v429_v56 }
 0x31f   :  { %v1021_v60 = vpop.eup %1020 }
 0x320   :  { %v437_v61 = vmul.f32 %v1021_v60, %v435_v59  ;;  %v979_v62 = vpack.i.bf16 %v1021_v60, %v422_v50 }
 0x322   :  { %980 = vrot.lane.b32.xlu0 %v979_v62, %s1162_s9  ;;  %439 = vrot.lane.b32.xlu1 %v437_v61, %s1163_s18 }
 0x394   :  { %v440_v3 = vpop.permute.xlu1 %439  ;;  %v981_v44 = vpop.permute.xlu0 %980 }
 0x395   :  { %v442_v4 = vadd.f32 %v440_v3, %v422_v50  ;;  %v982_v46 = vunpack.i.l.bf16 %v981_v44  ;;  %v983_v48 = vunpack.i.h.bf16 %v981_v44 }
 0x397   :  { %v443_v5 = vpack.c.bf16 %v442_v4, %v442_v4 }
 0x399   :  { %447 = vrot.lane.b32.xlu1 %v443_v5, %s1164_s23 }
 0x40b   :  { %v448_v11 = vpop.permute.xlu1 %447 }
 0x40c   :  { %v453_v12 = vsel %vm451_vm5, %v450_v10, %v448_v11 }
 0x40d   :  { %922 = vmatmul.mubr.msk.bf16.vlgmr.msra.gmra.mxu1 %vm477_vm6, %v453_v12 }
 0x40e   :  { %961 = vmatprep.mubr.msk.bf16.mxu1 %vm1158_vm0, %v1157_v0  ;;  %946 = vmatpush3.bf16.msra.mxu1 %v1012_v15 }
 0x40f   :  { %947 = vmatprep.subr.bf16.mxu1 %v1157_v0 }
 0x412   :  { %948 = vmatpush3.bf16.msra.mxu1 %v1013_v16 }
 0x413   :  { %949 = vmatprep.subr.bf16.mxu1 %v1157_v0 }
 0x416   :  { %950 = vmatpush3.bf16.msra.mxu1 %v1014_v17 }
 0x417   :  { %951 = vmatprep.subr.bf16.mxu1 %v1157_v0 }
 0x41a   :  { %952 = vmatpush3.bf16.msra.mxu1 %v1015_v18 }
 0x41b   :  { %953 = vmatprep.subr.bf16.mxu1 %v1157_v0 }
 0x41e   :  { %954 = vmatpush3.bf16.msra.mxu1 %v1016_v19 }
 0x41f   :  { %955 = vmatprep.subr.bf16.mxu1 %v1157_v0 }
 0x422   :  { %956 = vmatpush3.bf16.msra.mxu1 %v1017_v20 }
 0x423   :  { %957 = vmatprep.subr.bf16.mxu1 %v1157_v0 }
 0x426   :  { %958 = vmatpush3.bf16.msra.mxu1 %v1018_v29 }
 0x427   :  { %959 = vmatprep.subr.bf16.mxu1 %v1157_v0  ;;  %v818_v0 = vld [vmem:[%s1462_s15] ss:$0 sm:$0xff]  ;;  %s1124_s15 = scalar_lea.vmem %s773_s14, 64 }
 0x428   :  { %p1125_p11 = scmp.ne.s32.totalorder %s773_s14, %s1124_s15  ;;  %p1130_p13 = scmp.lt.s32.totalorder %s1124_s15, %s1124_s15 }
 0x42a   :  { %960 = vmatpush3.bf16.msra.mxu1 %v1019_v30  ;;  %p1131_p0 = por %p1130_p13, %p1129_p12 }
 0x42c   :  { %p1132_p1 = pnand %p1131_p0, %p1125_p11 }
 0x4cd   :  { %v514_v22 = vpop.f32.mrf.mxu1 }
 0x4ce   :  { %v515_v23 = vadd.f32 %v805_v21, %v514_v22 }
 0x4cf   :  { %v923_v24 = vpop.f32.mrf.mxu1 }
 0x4d0   :  { %v520_v25 = vmax.f32 %v515_v23, 0.0 }
 0x4d1   :  { %v517_v26 = vpop.f32.mrf.mxu1 }
 0x4d2   :  { %v521_v27 = vpack.c.bf16 %v520_v25, %v520_v25 }
 0x4d3   :  { %v924_v28 = vpop.f32.mrf.mxu1 }
 0x4d4   :  { %942 = vmatmul.mubr.bf16.vlgmr.msra.gmra.mxu0 %v521_v27 }
 0x594   :  { %v627_v32 = vpop.f32.mrf.mxu0 }
 0x595   :  { %v628_v33 = vadd.f32 %v809_v31, %v627_v32 }
 0x596   :  { %v943_v34 = vpop.f32.mrf.mxu0 }
 0x597   :  { %v633_v35 = vmax.f32 %v628_v33, 0.0 }
 0x598   :  { %v630_v36 = vpop.f32.mrf.mxu0 }
 0x599   :  { %v634_v37 = vpack.c.bf16 %v633_v35, %v633_v35 }
 0x59a   :  { %v944_v38 = vpop.f32.mrf.mxu0 }
 0x59b   :  { %962 = vmatmul.mubr.bf16.vlgmr.msra.gmra.mxu1 %v634_v37 }
 0x65b   :  { %v740_v39 = vpop.f32.mrf.mxu1 }
 0x65c   :  { %v741_v40 = vadd.f32 %v818_v0, %v740_v39 }
 0x65d   :  { %v963_v41 = vpop.f32.mrf.mxu1 }
 0x65e   :  { %1022 = vtanh.f32 %v741_v40 }
 0x65f   :  { %v743_v42 = vpop.f32.mrf.mxu1 }
 0x661   :  { %v964_v43 = vpop.f32.mrf.mxu1 }
 0x66b   :  { %v1023_v45 = vpop.eup %1022 }
 0x66c   :  { %v747_v47 = vmul.f32 2.0, %v1023_v45 }
 0x66e   :  { %v757_v49 = vsel %vm756_vm7, %v747_v47, %v982_v46 }
 0x66f   :  { %v758_v50 = vsel %vm125_vm2, %v757_v49, %v983_v48 }
 0x670   :  { %v759_v51 = vpack.c.bf16 %v758_v50, %v758_v50 }
 0x672   :  { %v763_v52 = vsel %vm760_vm8, %v759_v51, 0 }
 0x673   :  { %765 = vst [vmem:[#allocation11] sm:$0xf] %v763_v52 }
 0x674   :  { %1135 = shalt.err (!%p1132_p1)
}
 0x675   :  { %775 = dma.vmem_to_hbm [thread:$0]  %s773_s14, 64, %s1463_s16, [#allocation4]  }
 0x676   :  { %1150 = dma.done.wait [#allocation4], 64  }
 0x677   :  { %1151 = vsyncadd [#allocation4], 4294967232 }
 0x678   :  { %779 = vsyncpa [#allocation3], 1 }
 0x679   :  { %780 = vsyncpa [#allocation6], 1 }
 0x67a   :  { %781 = vsyncpa [#allocation9], 1 }
 0x67b   :  { %782 = vsyncpa [#allocation4], 1 }

</bundles_post_ra>
